<compile_context>
chip_gen: v5e
topology: v5e:2x2
jax: 0.10.0
libtpu: 0.0.40
codegen_flags: <defaults>
</compile_context>

<pallas_src>
import jax
import jax.numpy as jnp
from jax.experimental import pallas as pl
from jax.experimental.pallas import tpu as pltpu

# Logical dims (PyTorch module)
D_IN, D_H1, D_H2, D_OUT = 300, 256, 64, 2
# Output padded to a full lane group so stores are unmasked / lane-dense.
D_OUT_PAD = 128
# bf16 output packs two rows per sublane -> keep batch tiles multiples of 16.
SUBLANE_ALIGN = 16


def _mlp_kernel(x_ref, w1_ref, b1_ref, w2_ref, b2_ref, w3_ref, b3_ref, o_ref):
    """Fused 3-layer MLP on one batch tile: relu(x@W1+b1) @ W2+b2 -> relu -> @W3+b3."""
    # In-kernel bf16 cast keeps layer 1 (the FLOP-dominant matmul) on the native bf16 MXU
    # path; the cast is a cheap VPU op hidden under the x DMA.
    x = x_ref[...].astype(jnp.bfloat16)
    # Layer 1 (Dropout(0.2) -> identity in eval mode)
    h1 = jnp.dot(x, w1_ref[...], preferred_element_type=jnp.float32)
    h1 = jnp.maximum(h1 + b1_ref[...], 0.0).astype(jnp.bfloat16)
    # Layer 2 (Dropout(0.2) -> identity in eval mode)
    h2 = jnp.dot(h1, w2_ref[...], preferred_element_type=jnp.float32)
    h2 = jnp.maximum(h2 + b2_ref[...], 0.0).astype(jnp.bfloat16)
    # Layer 3 (logits, no activation); f32 accumulate, bf16 store.
    out = jnp.dot(h2, w3_ref[...], preferred_element_type=jnp.float32) + b3_ref[...]
    o_ref[...] = out.astype(jnp.bfloat16)


def _round_up(n, m):
    return ((n + m - 1) // m) * m


def _choose_tiling(B, max_tb):
    """Pick (TB, B_pad, n_tiles) with bounded tail padding and >=2 grid steps for big B."""
    n_tiles = pl.cdiv(B, max_tb)
    if B >= 512:
        # Guarantee at least 2 grid steps so the "parallel" batch axis lands on both
        # v7x TensorCores; TB stays >= 256 in this regime (MXU-friendly on v6e/v7x).
        n_tiles = max(n_tiles, 2)
    TB = _round_up(pl.cdiv(B, n_tiles), SUBLANE_ALIGN)
    B_pad = TB * n_tiles
    return TB, B_pad, n_tiles


def domain_classifier_forward(x, params, *, max_tb=1024):
    """x: [B, 300] float32. params: w{1,2,3} as [in,out] (f32), b{1,2,3} as [1,out] (f32).

    Returns [B, 2] bfloat16 logits (f32 MXU accumulation; bf16 only for the final store).
    """
    B = x.shape[0]
    TB, B_pad, n_tiles = _choose_tiling(B, max_tb)

    # Only row padding (at most TB*n_tiles - B extra rows); no dtype cast / column pad of x.
    if B_pad != B:
        x = jnp.pad(x, ((0, B_pad - B), (0, 0)))

    w1 = params["w1"].astype(jnp.bfloat16)                                   # (300, 256)
    b1 = params["b1"].astype(jnp.float32)                                    # (1, 256)
    w2 = params["w2"].astype(jnp.bfloat16)                                   # (256, 64)
    b2 = params["b2"].astype(jnp.float32)                                    # (1, 64)
    w3 = jnp.pad(params["w3"].astype(jnp.bfloat16),
                 ((0, 0), (0, D_OUT_PAD - D_OUT)))                           # (64, 128)
    b3 = jnp.pad(params["b3"].astype(jnp.float32),
                 ((0, 0), (0, D_OUT_PAD - D_OUT)))                           # (1, 128)

    const = lambda i: (0, 0)  # weights/biases: same block every step -> stay VMEM-resident

    flops = 2 * B_pad * (D_IN * D_H1 + D_H1 * D_H2 + D_H2 * D_OUT_PAD)
    bytes_accessed = (
        B_pad * D_IN * 4                                            # x (f32, read in-kernel)
        + B_pad * D_OUT_PAD * 2                                     # out (bf16)
        + (D_IN * D_H1 + D_H1 * D_H2 + D_H2 * D_OUT_PAD) * 2        # weights (bf16)
        + (D_H1 + D_H2 + D_OUT_PAD) * 4                             # biases (f32)
    )

    out_pad = pl.pallas_call(
        _mlp_kernel,
        out_shape=jax.ShapeDtypeStruct((B_pad, D_OUT_PAD), jnp.bfloat16),
        grid=(n_tiles,),
        in_specs=[
            # x streamed per batch tile; full-extent K=300 (Mosaic pads K in VMEM).
            pl.BlockSpec((TB, D_IN), lambda i: (i, 0)),
            pl.BlockSpec((D_IN, D_H1), const),          # w1 (pinned)
            pl.BlockSpec((1, D_H1), const),             # b1 (pinned)
            pl.BlockSpec((D_H1, D_H2), const),          # w2 (pinned)
            pl.BlockSpec((1, D_H2), const),             # b2 (pinned)
            pl.BlockSpec((D_H2, D_OUT_PAD), const),     # w3 (pinned)
            pl.BlockSpec((1, D_OUT_PAD), const),        # b3 (pinned)
        ],
        out_specs=pl.BlockSpec((TB, D_OUT_PAD), lambda i: (i, 0)),
        compiler_params=pltpu.CompilerParams(
            dimension_semantics=("parallel",),          # megacore sharding on v7x
            vmem_limit_bytes=32 * 1024 * 1024,
        ),
        cost_estimate=pl.CostEstimate(
            flops=flops, transcendentals=0, bytes_accessed=bytes_accessed
        ),
    )(x, w1, b1, w2, b2, w3, b3)

    # Slice away batch / output padding outside the kernel. (For large-B serving, prefer
    # returning the padded bf16 buffer and letting the consumer slice/fuse lazily.)
    return out_pad[:B, :D_OUT]


def init_params(key):
    """Deterministic init mimicking PyTorch nn.Linear (uniform +-1/sqrt(fan_in)); weights [in,out]."""
    dims = [(D_IN, D_H1), (D_H1, D_H2), (D_H2, D_OUT)]
    params = {}
    for i, (fan_in, fan_out) in enumerate(dims, start=1):
        key, kw, kb = jax.random.split(key, 3)
        bound = 1.0 / jnp.sqrt(jnp.float32(fan_in))
        params[f"w{i}"] = jax.random.uniform(
            kw, (fan_in, fan_out), jnp.float32, minval=-bound, maxval=bound
        )
        params[f"b{i}"] = jax.random.uniform(
            kb, (1, fan_out), jnp.float32, minval=-bound, maxval=bound
        )
    return params


def _reference_forward(x, params):
    """Pure-JAX reference with the same bf16-in / f32-accumulate arithmetic as the kernel."""
    xb = x.astype(jnp.bfloat16)
    w1 = params["w1"].astype(jnp.bfloat16)
    w2 = params["w2"].astype(jnp.bfloat16)
    w3 = params["w3"].astype(jnp.bfloat16)
    h1 = jnp.maximum(
        jnp.dot(xb, w1, preferred_element_type=jnp.float32) + params["b1"], 0.0
    ).astype(jnp.bfloat16)
    h2 = jnp.maximum(
        jnp.dot(h1, w2, preferred_element_type=jnp.float32) + params["b2"], 0.0
    ).astype(jnp.bfloat16)
    return jnp.dot(h2, w3, preferred_element_type=jnp.float32) + params["b3"]


if __name__ == "__main__":
    key = jax.random.PRNGKey(0)
    key, kx = jax.random.split(key)

    B = 8
    x = jax.random.normal(kx, (B, D_IN), jnp.float32)
    params = init_params(key)

    out = domain_classifier_forward(x, params)
    out = jax.block_until_ready(out)

    assert out.shape == (B, D_OUT), out.shape
    out_f32 = out.astype(jnp.float32)

    # vs JAX reference with matching bf16-input / f32-accumulate math (output rounded bf16)
    ref = _reference_forward(x, params)
    assert jnp.allclose(out_f32, ref, atol=1.5e-2, rtol=1.5e-2), "mismatch vs JAX reference"

    # sanity vs full-f32 math (looser: bf16 rounding of inputs/weights/activations/output)
    ref_f32 = jnp.maximum(x @ params["w1"] + params["b1"], 0.0)
    ref_f32 = jnp.maximum(ref_f32 @ params["w2"] + params["b2"], 0.0)
    ref_f32 = ref_f32 @ params["w3"] + params["b3"]
    assert jnp.allclose(out_f32, ref_f32, atol=7e-2, rtol=7e-2), "mismatch vs f32 reference"

    print("KERNEL_OK")
</pallas_src>

<mosaic_0001>
module attributes {stable_mosaic.version = 11 : i64} {
  func.func @_mlp_kernel(%arg0: i32, %arg1: memref<16x300xf32, #tpu.memory_space<vmem>>, %arg2: memref<300x256xbf16, #tpu.memory_space<vmem>>, %arg3: memref<1x256xf32, #tpu.memory_space<vmem>>, %arg4: memref<256x64xbf16, #tpu.memory_space<vmem>>, %arg5: memref<1x64xf32, #tpu.memory_space<vmem>>, %arg6: memref<64x128xbf16, #tpu.memory_space<vmem>>, %arg7: memref<1x128xf32, #tpu.memory_space<vmem>>, %arg8: memref<16x128xbf16, #tpu.memory_space<vmem>>) attributes {dimension_semantics = [#tpu.dimension_semantics<parallel>], iteration_bounds = array<i64: 1>, scalar_prefetch = 0 : i64, scratch_operands = 0 : i64, tpu.core_type = #tpu.core_type<tc>, window_params = [{transform_indices = @transform_0, window_bounds = array<i64: 16, 300>}, {pipeline_mode = #tpu.pipeline_mode<synchronous>, transform_indices = @transform_1, window_bounds = array<i64: 300, 256>}, {pipeline_mode = #tpu.pipeline_mode<synchronous>, transform_indices = @transform_2, window_bounds = array<i64: 1, 256>}, {pipeline_mode = #tpu.pipeline_mode<synchronous>, transform_indices = @transform_3, window_bounds = array<i64: 256, 64>}, {pipeline_mode = #tpu.pipeline_mode<synchronous>, transform_indices = @transform_4, window_bounds = array<i64: 1, 64>}, {pipeline_mode = #tpu.pipeline_mode<synchronous>, transform_indices = @transform_5, window_bounds = array<i64: 64, 128>}, {pipeline_mode = #tpu.pipeline_mode<synchronous>, transform_indices = @transform_6, window_bounds = array<i64: 1, 128>}, {transform_indices = @transform_7, window_bounds = array<i64: 16, 128>}]} {
    %c0 = arith.constant 0 : index
    %c0_0 = arith.constant 0 : index
    %0 = vector.load %arg1[%c0, %c0_0] : memref<16x300xf32, #tpu.memory_space<vmem>>, vector<16x300xf32>
    %1 = arith.truncf %0 : vector<16x300xf32> to vector<16x300xbf16>
    %c0_1 = arith.constant 0 : index
    %c0_2 = arith.constant 0 : index
    %2 = vector.load %arg2[%c0_1, %c0_2] : memref<300x256xbf16, #tpu.memory_space<vmem>>, vector<300x256xbf16>
    %cst = arith.constant dense<0.000000e+00> : vector<16x256xf32>
    %3 = tpu.matmul %1, %2, %cst {dimension_numbers = #tpu.dot_dimension_numbers<[1], [0], [0], [1], [0, 0, 1, 1], [], []>} : vector<16x300xbf16>, vector<300x256xbf16>, vector<16x256xf32> -> vector<16x256xf32>
    %c0_3 = arith.constant 0 : index
    %c0_4 = arith.constant 0 : index
    %4 = vector.load %arg3[%c0_3, %c0_4] : memref<1x256xf32, #tpu.memory_space<vmem>>, vector<1x256xf32>
    %5 = vector.broadcast %4 : vector<1x256xf32> to vector<16x256xf32>
    %6 = arith.addf %3, %5 : vector<16x256xf32>
    %cst_5 = arith.constant 0.000000e+00 : f32
    %7 = vector.broadcast %cst_5 : f32 to vector<16x256xf32>
    %8 = arith.maximumf %6, %7 : vector<16x256xf32>
    %9 = arith.truncf %8 : vector<16x256xf32> to vector<16x256xbf16>
    %c0_6 = arith.constant 0 : index
    %c0_7 = arith.constant 0 : index
    %10 = vector.load %arg4[%c0_6, %c0_7] : memref<256x64xbf16, #tpu.memory_space<vmem>>, vector<256x64xbf16>
    %cst_8 = arith.constant dense<0.000000e+00> : vector<16x64xf32>
    %11 = tpu.matmul %9, %10, %cst_8 {dimension_numbers = #tpu.dot_dimension_numbers<[1], [0], [0], [1], [0, 0, 1, 1], [], []>} : vector<16x256xbf16>, vector<256x64xbf16>, vector<16x64xf32> -> vector<16x64xf32>
    %c0_9 = arith.constant 0 : index
    %c0_10 = arith.constant 0 : index
    %12 = vector.load %arg5[%c0_9, %c0_10] : memref<1x64xf32, #tpu.memory_space<vmem>>, vector<1x64xf32>
    %13 = vector.broadcast %12 : vector<1x64xf32> to vector<16x64xf32>
    %14 = arith.addf %11, %13 : vector<16x64xf32>
    %cst_11 = arith.constant 0.000000e+00 : f32
    %15 = vector.broadcast %cst_11 : f32 to vector<16x64xf32>
    %16 = arith.maximumf %14, %15 : vector<16x64xf32>
    %17 = arith.truncf %16 : vector<16x64xf32> to vector<16x64xbf16>
    %c0_12 = arith.constant 0 : index
    %c0_13 = arith.constant 0 : index
    %18 = vector.load %arg6[%c0_12, %c0_13] : memref<64x128xbf16, #tpu.memory_space<vmem>>, vector<64x128xbf16>
    %cst_14 = arith.constant dense<0.000000e+00> : vector<16x128xf32>
    %19 = tpu.matmul %17, %18, %cst_14 {dimension_numbers = #tpu.dot_dimension_numbers<[1], [0], [0], [1], [0, 0, 1, 1], [], []>} : vector<16x64xbf16>, vector<64x128xbf16>, vector<16x128xf32> -> vector<16x128xf32>
    %c0_15 = arith.constant 0 : index
    %c0_16 = arith.constant 0 : index
    %20 = vector.load %arg7[%c0_15, %c0_16] : memref<1x128xf32, #tpu.memory_space<vmem>>, vector<1x128xf32>
    %21 = vector.broadcast %20 : vector<1x128xf32> to vector<16x128xf32>
    %22 = arith.addf %19, %21 : vector<16x128xf32>
    %23 = arith.truncf %22 : vector<16x128xf32> to vector<16x128xbf16>
    %c0_17 = arith.constant 0 : index
    %c0_18 = arith.constant 0 : index
    %24 = vector.load %arg8[%c0_17, %c0_18] : memref<16x128xbf16, #tpu.memory_space<vmem>>, vector<16x128xbf16>
    tpu.vector_store %arg8[%c0_17, %c0_18], %23 {strides = array<i32>} : memref<16x128xbf16, #tpu.memory_space<vmem>>, vector<16x128xbf16>,
    return
  }
  func.func @transform_0(%arg0: i32) -> (i32, i32) {
    %c0_i32 = arith.constant 0 : i32
    %c0_i32_0 = arith.constant 0 : i32
    return %arg0, %c0_i32 : i32, i32
  }
  func.func @transform_1(%arg0: i32) -> (i32, i32) {
    %c0_i32 = arith.constant 0 : i32
    %c0_i32_0 = arith.constant 0 : i32
    %c0_i32_1 = arith.constant 0 : i32
    return %c0_i32, %c0_i32_0 : i32, i32
  }
  func.func @transform_2(%arg0: i32) -> (i32, i32) {
    %c0_i32 = arith.constant 0 : i32
    %c0_i32_0 = arith.constant 0 : i32
    %c0_i32_1 = arith.constant 0 : i32
    return %c0_i32, %c0_i32_0 : i32, i32
  }
  func.func @transform_3(%arg0: i32) -> (i32, i32) {
    %c0_i32 = arith.constant 0 : i32
    %c0_i32_0 = arith.constant 0 : i32
    %c0_i32_1 = arith.constant 0 : i32
    return %c0_i32, %c0_i32_0 : i32, i32
  }
  func.func @transform_4(%arg0: i32) -> (i32, i32) {
    %c0_i32 = arith.constant 0 : i32
    %c0_i32_0 = arith.constant 0 : i32
    %c0_i32_1 = arith.constant 0 : i32
    return %c0_i32, %c0_i32_0 : i32, i32
  }
  func.func @transform_5(%arg0: i32) -> (i32, i32) {
    %c0_i32 = arith.constant 0 : i32
    %c0_i32_0 = arith.constant 0 : i32
    %c0_i32_1 = arith.constant 0 : i32
    return %c0_i32, %c0_i32_0 : i32, i32
  }
  func.func @transform_6(%arg0: i32) -> (i32, i32) {
    %c0_i32 = arith.constant 0 : i32
    %c0_i32_0 = arith.constant 0 : i32
    %c0_i32_1 = arith.constant 0 : i32
    return %c0_i32, %c0_i32_0 : i32, i32
  }
  func.func @transform_7(%arg0: i32) -> (i32, i32) {
    %c0_i32 = arith.constant 0 : i32
    %c0_i32_0 = arith.constant 0 : i32
    return %arg0, %c0_i32 : i32, i32
  }
}

</mosaic_0001>

<bundles_post_ra>
// kernel: tpu_custom_call.1
= control target key start
LH: loop header
LB: loop body
LE: loop exit
PB: predicated region body
PF: predicated region fallthrough
CT: control target
= control target key end

     0   :  { %12 = vsyncpa [#allocation3], 0  ;;  %s1131_s0 = inlined_call_operand.vmem [shape: f32[16,300], index: 0, kind: input, shape index: {}]   ;;  %s1132_s1 = inlined_call_operand.hbm [shape: bf16[300,256], index: 1, kind: input, shape index: {}]   ;;  %s1133_s2 = inlined_call_operand.vmem [shape: f32[1,256], index: 2, kind: input, shape index: {}]   ;;  %s1134_s3 = inlined_call_operand.vmem [shape: bf16[256,64], index: 3, kind: input, shape index: {}]   ;;  %s1135_s4 = inlined_call_operand.vmem [shape: f32[1,64], index: 4, kind: input, shape index: {}]   ;;  %s1136_s5 = inlined_call_operand.vmem [shape: bf16[64,128], index: 5, kind: input, shape index: {}]   ;;  %s1137_s6 = inlined_call_operand.vmem [shape: f32[1,128], index: 6, kind: input, shape index: {}]   ;;  %s1138_s7 = inlined_call_operand.hbm [shape: bf16[16,128], index: 7, kind: output, shape index: {}]  }
   0x1   :  { %13 = vsyncpa [#allocation4], 0  ;;  %s20_s26 = sshll.u32 %s1132_s1, 4  ;;  %s984_s27 = smov [#allocation2]   ;;  %s21_s26 = int_to_ptr.hbm [resolvable:$true] %s20_s26 }
   0x2   :  { %s22_s28 = sshll.u32 %s984_s27, 4  ;;  %s985_s29 = smov 128   ;;  %s23_s28 = int_to_ptr.vmem [resolvable:$true] %s22_s28 }
   0x3   :  { %s986_s30 = smov 8  }
   0x4   :  { %28 = dma.hbm_to_vmem [thread:$0]  %s21_s26, 4864, %s23_s28, [#allocation3], %s985_s29, %s985_s29, %s986_s30  }
   0x5   :  { %980 = dma.done.wait [#allocation3], 4864  }
   0x6   :  { %981 = vsyncadd [#allocation3], 4294962432  ;;  %vm289_vm0 = vcmask 1045504   ;;  %v684_v0 = vld [vmem:[#allocation2 + $0x70] sm:$0xf]  ;;  %v49_v56 = vld [vmem:[%s1131_s0 + $0x28] sm:$0xff] }
   0x7   :  { %v876_v1 = vld [vmem:[#allocation2 + $0x74] sm:$0xf0]  ;;  %v875_v2 = vld [vmem:[#allocation2 + $0x74] sm:$0xf]  ;;  %v686_v4 = vld [vmem:[#allocation2 + $0x78] sm:$0xf0] }
   0x8   :  { %v685_v3 = vor.u32 %v876_v1, %v684_v0  ;;  %v772_v5 = vld [vmem:[#allocation2 + $0x120] sm:$0xf]  ;;  %v898_v6 = vld [vmem:[#allocation2 + $0x124] sm:$0x30]  ;;  %v689_v7 = vor.u32 %v875_v2, %v686_v4  ;;  %v748_v9 = vld [vmem:[#allocation2 + $0xf0] sm:$0xf] }
   0x9   :  { %v773_v8 = vor.u32 %v898_v6, %v772_v5  ;;  %v892_v10 = vld [vmem:[#allocation2 + $0xf4] sm:$0xf0]  ;;  %v676_v11 = vld [vmem:[#allocation2 + $0x60] sm:$0xf]  ;;  %v874_v13 = vld [vmem:[#allocation2 + $0x64] sm:$0xf0] }
   0xa   :  { %296 = vmatpush.bf16.msra.mxu0 %v685_v3  ;;  %v749_v12 = vor.u32 %v892_v10, %v748_v9  ;;  %v873_v14 = vld [vmem:[#allocation2 + $0x64] sm:$0xf]  ;;  %v678_v15 = vld [vmem:[#allocation2 + $0x68] sm:$0xf0]  ;;  %338 = vmatpush.bf16.msra.mxu3 %v689_v7  ;;  %v677_v17 = vor.u32 %v874_v13, %v676_v11  ;;  %v764_v19 = vld [vmem:[#allocation2 + $0x110] sm:$0xf] }
   0xb   :  { %v291_v16 = vsel %vm289_vm0, %v773_v8, 0  ;;  %v681_v18 = vor.u32 %v873_v14, %v678_v15  ;;  %v896_v20 = vld [vmem:[#allocation2 + $0x114] sm:$0xf0]  ;;  %v740_v22 = vld [vmem:[#allocation2 + $0xe0] sm:$0xf]  ;;  %v46_v49 = vld [vmem:[%s1131_s0 + $0x10] sm:$0xff] }
   0xc   :  { %329 = vmatpush.bf16.msra.mxu2 %v291_v16  ;;  %310 = vmatpush.bf16.msra.mxu1 %v749_v12  ;;  %v765_v21 = vor.u32 %v896_v20, %v764_v19  ;;  %v890_v23 = vld [vmem:[#allocation2 + $0xe4] sm:$0xf0]  ;;  %v668_v24 = vld [vmem:[#allocation2 + $0x50] sm:$0xf]  ;;  %v872_v26 = vld [vmem:[#allocation2 + $0x54] sm:$0xf0]  ;;  %v1040_v58 = vpack.c.bf16 %v49_v56, %v46_v49 }
   0xd   :  { %v741_v25 = vor.u32 %v890_v23, %v740_v22  ;;  %v871_v27 = vld [vmem:[#allocation2 + $0x54] sm:$0xf]  ;;  %v670_v28 = vld [vmem:[#allocation2 + $0x58] sm:$0xf0]  ;;  %v669_v29 = vor.u32 %v872_v26, %v668_v24  ;;  %v756_v30 = vld [vmem:[#allocation2 + $0x100] sm:$0xf] }
   0xe   :  { %297 = vmatpush.bf16.msra.mxu0 %v677_v17  ;;  %v894_v31 = vld [vmem:[#allocation2 + $0x104] sm:$0xf0]  ;;  %v732_v32 = vld [vmem:[#allocation2 + $0xd0] sm:$0xf]  ;;  %339 = vmatpush.bf16.msra.mxu3 %v681_v18  ;;  %v673_v33 = vor.u32 %v871_v27, %v670_v28  ;;  %v888_v34 = vld [vmem:[#allocation2 + $0xd4] sm:$0xf0] }
   0xf   :  { %v891_v35 = vld [vmem:[#allocation2 + $0xf4] sm:$0xf]  ;;  %v750_v36 = vld [vmem:[#allocation2 + $0xf8] sm:$0xf0]  ;;  %v757_v37 = vor.u32 %v894_v31, %v756_v30  ;;  %v733_v38 = vor.u32 %v888_v34, %v732_v32  ;;  %v660_v39 = vld [vmem:[#allocation2 + $0x40] sm:$0xf] }
  0x10   :  { %330 = vmatpush.bf16.msra.mxu2 %v765_v21  ;;  %311 = vmatpush.bf16.msra.mxu1 %v741_v25  ;;  %v870_v40 = vld [vmem:[#allocation2 + $0x44] sm:$0xf0]  ;;  %v869_v41 = vld [vmem:[#allocation2 + $0x44] sm:$0xf]  ;;  %v753_v42 = vor.u32 %v891_v35, %v750_v36  ;;  %v662_v43 = vld [vmem:[#allocation2 + $0x48] sm:$0xf0] }
  0x11   :  { %v724_v44 = vld [vmem:[#allocation2 + $0xc0] sm:$0xf]  ;;  %v886_v45 = vld [vmem:[#allocation2 + $0xc4] sm:$0xf0]  ;;  %v661_v46 = vor.u32 %v870_v40, %v660_v39  ;;  %v889_v47 = vld [vmem:[#allocation2 + $0xe4] sm:$0xf]  ;;  %v665_v50 = vor.u32 %v869_v41, %v662_v43 }
  0x12   :  { %298 = vmatpush.bf16.msra.mxu0 %v669_v29  ;;  %v742_v48 = vld [vmem:[#allocation2 + $0xe8] sm:$0xf0]  ;;  %340 = vmatpush.bf16.msra.mxu3 %v673_v33  ;;  %v652_v51 = vld [vmem:[#allocation2 + $0x30] sm:$0xf]  ;;  %v868_v52 = vld [vmem:[#allocation2 + $0x34] sm:$0xf0]  ;;  %v725_v53 = vor.u32 %v886_v45, %v724_v44 }
  0x13   :  { %v867_v54 = vld [vmem:[#allocation2 + $0x34] sm:$0xf]  ;;  %v654_v55 = vld [vmem:[#allocation2 + $0x38] sm:$0xf0]  ;;  %vm285_vm1 = vcmask 359424   ;;  %v745_v57 = vor.u32 %v889_v47, %v742_v48  ;;  %v653_v61 = vor.u32 %v868_v52, %v652_v51  ;;  %v44_v39 = vld [vmem:[%s1131_s0] sm:$0xff] }
  0x14   :  { %331 = vmatpush.bf16.msra.mxu2 %v757_v37  ;;  %312 = vmatpush.bf16.msra.mxu1 %v733_v38  ;;  %v716_v59 = vld [vmem:[#allocation2 + $0xb0] sm:$0xf]  ;;  %v884_v60 = vld [vmem:[#allocation2 + $0xb4] sm:$0xf0]  ;;  %v887_v62 = vld [vmem:[#allocation2 + $0xd4] sm:$0xf]  ;;  %v657_v0 = vor.u32 %v867_v54, %v654_v55 }
  0x15   :  { %v734_v63 = vld [vmem:[#allocation2 + $0xd8] sm:$0xf0]  ;;  %v644_v1 = vld [vmem:[#allocation2 + $0x20] sm:$0xf]  ;;  %v866_v2 = vld [vmem:[#allocation2 + $0x24] sm:$0xf0]  ;;  %v717_v3 = vor.u32 %v884_v60, %v716_v59 }
  0x16   :  { %299 = vmatpush.bf16.msra.mxu0 %v661_v46  ;;  %341 = vmatpush.bf16.msra.mxu3 %v665_v50  ;;  %v865_v4 = vld [vmem:[#allocation2 + $0x24] sm:$0xf]  ;;  %v646_v5 = vld [vmem:[#allocation2 + $0x28] sm:$0xf0]  ;;  %v737_v6 = vor.u32 %v887_v62, %v734_v63  ;;  %v708_v7 = vld [vmem:[#allocation2 + $0xa0] sm:$0xf]  ;;  %v645_v9 = vor.u32 %v866_v2, %v644_v1 }
  0x17   :  { %778 = vmatmul.msk.bf16.vlgmr.msra.gmra.mxu2 %vm285_vm1, %v1040_v58  ;;  %v882_v8 = vld [vmem:[#allocation2 + $0xa4] sm:$0xf0]  ;;  %v885_v10 = vld [vmem:[#allocation2 + $0xc4] sm:$0xf]  ;;  %v726_v11 = vld [vmem:[#allocation2 + $0xc8] sm:$0xf0]  ;;  %v649_v12 = vor.u32 %v865_v4, %v646_v5 }
  0x18   :  { %352 = vmatpush.bf16.msrb.mxu2 %v753_v42  ;;  %313 = vmatpush.bf16.msra.mxu1 %v725_v53  ;;  %v636_v13 = vld [vmem:[#allocation2 + $0x10] sm:$0xf]  ;;  %v864_v14 = vld [vmem:[#allocation2 + $0x14] sm:$0xf0]  ;;  %v709_v15 = vor.u32 %v882_v8, %v708_v7  ;;  %v863_v16 = vld [vmem:[#allocation2 + $0x14] sm:$0xf]  ;;  %v729_v18 = vor.u32 %v885_v10, %v726_v11 }
  0x19   :  { %v638_v17 = vld [vmem:[#allocation2 + $0x18] sm:$0xf0]  ;;  %v700_v19 = vld [vmem:[#allocation2 + $0x90] sm:$0xf]  ;;  %v880_v20 = vld [vmem:[#allocation2 + $0x94] sm:$0xf0]  ;;  %v637_v21 = vor.u32 %v864_v14, %v636_v13 }
  0x1a   :  { %300 = vmatpush.bf16.msra.mxu0 %v653_v61  ;;  %342 = vmatpush.bf16.msra.mxu3 %v657_v0  ;;  %v883_v22 = vld [vmem:[#allocation2 + $0xb4] sm:$0xf]  ;;  %v718_v23 = vld [vmem:[#allocation2 + $0xb8] sm:$0xf0]  ;;  %v628_v24 = vld [vmem:[#allocation2] sm:$0xf]  ;;  %v641_v25 = vor.u32 %v863_v16, %v638_v17  ;;  %v701_v29 = vor.u32 %v880_v20, %v700_v19 }
  0x1b   :  { %v862_v26 = vld [vmem:[#allocation2 + $0x4] sm:$0xf0]  ;;  %v897_v27 = vld [vmem:[#allocation2 + $0x124] sm:$0xf]  ;;  %v774_v28 = vld [vmem:[#allocation2 + $0x128] sm:$0x30]  ;;  %v721_v34 = vor.u32 %v883_v22, %v718_v23 }
  0x1c   :  { %353 = vmatpush.bf16.msrb.mxu2 %v745_v57  ;;  %314 = vmatpush.bf16.msra.mxu1 %v717_v3  ;;  %v861_v30 = vld [vmem:[#allocation2 + $0x4] sm:$0xf]  ;;  %v630_v31 = vld [vmem:[#allocation2 + $0x8] sm:$0xf0]  ;;  %v692_v32 = vld [vmem:[#allocation2 + $0x80] sm:$0xf]  ;;  %v777_v33 = vor.u32 %v897_v27, %v774_v28  ;;  %v629_v38 = vor.u32 %v862_v26, %v628_v24 }
  0x1d   :  { %v878_v35 = vld [vmem:[#allocation2 + $0x84] sm:$0xf0]  ;;  %v881_v36 = vld [vmem:[#allocation2 + $0xa4] sm:$0xf]  ;;  %v710_v37 = vld [vmem:[#allocation2 + $0xa8] sm:$0xf0]  ;;  %v633_v41 = vor.u32 %v861_v30, %v630_v31 }
  0x1e   :  { %301 = vmatpush.bf16.msra.mxu0 %v645_v9  ;;  %343 = vmatpush.bf16.msra.mxu3 %v649_v12  ;;  %v47_v40 = vld [vmem:[%s1131_s0 + $0x18] sm:$0xff]  ;;  %v45_v42 = vld [vmem:[%s1131_s0 + $0x8] sm:$0xff]  ;;  %v693_v43 = vor.u32 %v878_v35, %v692_v32  ;;  %v48_v44 = vld [vmem:[%s1131_s0 + $0x20] sm:$0xff]  ;;  %v294_v45 = vsel %vm289_vm0, %v777_v33, 0  ;;  %v713_v48 = vor.u32 %v881_v36, %v710_v37  ;;  %vm585_vm2 = vcmask 523264   ;;  %s987_s12 = smov [#allocation5]  }
  0x1f   :  { %v895_v46 = vld [vmem:[#allocation2 + $0x114] sm:$0xf]  ;;  %v766_v47 = vld [vmem:[#allocation2 + $0x118] sm:$0xf0]  ;;  %v50_v49 = vpack.c.bf16 %v47_v40, %v44_v39  ;;  %v51_v53 = vpack.c.bf16 %v48_v44, %v45_v42  ;;  %v893_v55 = vld [vmem:[#allocation2 + $0x104] sm:$0xf] }
  0x20   :  { %354 = vmatpush.bf16.msrb.mxu2 %v737_v6  ;;  %315 = vmatpush.bf16.msra.mxu1 %v709_v15  ;;  %v879_v50 = vld [vmem:[#allocation2 + $0x94] sm:$0xf]  ;;  %v702_v51 = vld [vmem:[#allocation2 + $0x98] sm:$0xf0]  ;;  %v769_v54 = vor.u32 %v895_v46, %v766_v47  ;;  %v758_v56 = vld [vmem:[#allocation2 + $0x108] sm:$0xf0] }
  0x21   :  { %v906_v52 = vld [vmem:[%s1134_s3 + $0x38] sm:$0xff]  ;;  %v705_v57 = vor.u32 %v879_v50, %v702_v51  ;;  %v877_v59 = vld [vmem:[#allocation2 + $0x84] sm:$0xf]  ;;  %v694_v60 = vld [vmem:[#allocation2 + $0x88] sm:$0xf0]  ;;  %v761_v61 = vor.u32 %v893_v55, %v758_v56  ;;  %s611_s13 = sshll.u32 %s987_s12, 4  ;;  %s612_s13 = int_to_ptr.vmem [resolvable:$true] %s611_s13 }
  0x22   :  { %302 = vmatpush.bf16.msra.mxu0 %v637_v21  ;;  %344 = vmatpush.bf16.msra.mxu3 %v641_v25  ;;  %v697_v62 = vor.u32 %v877_v59, %v694_v60  ;;  %v905_v63 = vld [vmem:[%s1134_s3 + $0x30] sm:$0xff]  ;;  %v904_v0 = vld [vmem:[%s1134_s3 + $0x28] sm:$0xff]  ;;  %v903_v1 = vld [vmem:[%s1134_s3 + $0x20] sm:$0xff]  ;;  %s613_s15 = sshll.u32 %s1138_s7, 4  ;;  %s988_s16 = smov 64   ;;  %s614_s15 = int_to_ptr.hbm [resolvable:$true] %s613_s15 }
  0x23   :  { %v914_v2 = vld [vmem:[%s1134_s3 + $0x78] sm:$0xff]  ;;  %v913_v3 = vld [vmem:[%s1134_s3 + $0x70] sm:$0xff]  ;;  %v912_v5 = vld [vmem:[%s1134_s3 + $0x68] sm:$0xff]  ;;  %s989_s17 = smov 4  }
  0x24   :  { %355 = vmatpush.bf16.msrb.mxu2 %v729_v18  ;;  %316 = vmatpush.bf16.msra.mxu1 %v701_v29  ;;  %v901_v4 = vld [vmem:[%s1134_s3 + $0x10] sm:$0xff]  ;;  %v900_v6 = vld [vmem:[%s1134_s3 + $0x8] sm:$0xff]  ;;  %v911_v7 = vld [vmem:[%s1134_s3 + $0x60] sm:$0xff] }
  0x25   :  { %v899_v8 = vld [vmem:[%s1134_s3] sm:$0xff]  ;;  %v910_v9 = vld [vmem:[%s1134_s3 + $0x58] sm:$0xff]  ;;  %v909_v10 = vld [vmem:[%s1134_s3 + $0x50] sm:$0xff] }
  0x26   :  { %303 = vmatpush.bf16.msra.mxu0 %v629_v38  ;;  %345 = vmatpush.bf16.msra.mxu3 %v633_v41  ;;  %v908_v11 = vld [vmem:[%s1134_s3 + $0x48] sm:$0xff]  ;;  %v91_v12 = vld [vmem:[%s1133_s2] sm:$0x3]  ;;  %v918_v46 = vld [vmem:[%s1136_s5 + $0x18] sm:$0xff] }
  0x27   :  { %v907_v13 = vld [vmem:[%s1134_s3 + $0x40] sm:$0xff]  ;;  %v93_v15 = vperm.slane %v91_v12, 0  ;;  %v94_v28 = vperm.slane %v91_v12, 1  ;;  %v917_v47 = vld [vmem:[%s1136_s5 + $0x10] sm:$0xff] }
  0x28   :  { %356 = vmatpush.bf16.msrb.mxu2 %v721_v34  ;;  %317 = vmatpush.bf16.msra.mxu1 %v693_v43 }
  0x29   :  { %304 = vmatmul.bf16.vlgmr.msra.gmra.mxu0 %v50_v49  ;;  %346 = vmatmul.bf16.vlgmr.msra.gmra.mxu3 %v50_v49  ;;  %v915_v49 = vld [vmem:[%s1136_s5] sm:$0xff] }
  0x2a   :  { %371 = vmatpush.bf16.msrb.mxu0 %v294_v45  ;;  %532 = vmatpush.bf16.msrb.mxu3 %v914_v2 }
  0x2b   :  { %318 = vmatmul.bf16.vlgmr.msra.gmra.mxu1 %v51_v53 }
  0x2c   :  { %357 = vmatpush.bf16.msrb.mxu2 %v713_v48  ;;  %518 = vmatpush.bf16.msrb.mxu1 %v906_v52  ;;  %v916_v48 = vld [vmem:[%s1136_s5 + $0x8] sm:$0xff]  ;;  %v930_v52 = vld [vmem:[%s1135_s4] ss:$0 sm:$0xff] }
  0x2e   :  { %372 = vmatpush.bf16.msrb.mxu0 %v769_v54  ;;  %533 = vmatpush.bf16.msrb.mxu3 %v913_v3 }
  0x30   :  { %358 = vmatpush.bf16.msrb.mxu2 %v705_v57  ;;  %519 = vmatpush.bf16.msrb.mxu1 %v905_v63 }
  0x32   :  { %373 = vmatpush.bf16.msrb.mxu0 %v761_v61  ;;  %534 = vmatpush.bf16.msrb.mxu3 %v912_v5 }
  0x34   :  { %359 = vmatpush.bf16.msrb.mxu2 %v697_v62  ;;  %520 = vmatpush.bf16.msrb.mxu1 %v904_v0  ;;  %v931_v0 = vld [vmem:[%s1137_s6] ss:$0 sm:$0xff] }
  0x36   :  { %535 = vmatpush.bf16.msrb.mxu3 %v911_v7 }
  0x37   :  { %360 = vmatmul.bf16.vlgmr.msrb.gmra.mxu2 %v51_v53 }
  0x38   :  { %521 = vmatpush.bf16.msrb.mxu1 %v903_v1  ;;  %593 = vmatpush.bf16.msra.mxu2 %v918_v46 }
  0x39   :  { %779 = vmatmul.msk.bf16.vlgmr.msrb.gmra.mxu0 %vm285_vm1, %v1040_v58  ;;  %v902_v58 = vld [vmem:[%s1134_s3 + $0x18] sm:$0xff] }
  0x3a   :  { %536 = vmatpush.bf16.msrb.mxu3 %v910_v9 }
  0x3c   :  { %522 = vmatpush.bf16.msrb.mxu1 %v902_v58  ;;  %594 = vmatpush.bf16.msra.mxu2 %v917_v47 }
  0x3e   :  { %537 = vmatpush.bf16.msrb.mxu3 %v909_v10 }
  0x40   :  { %523 = vmatpush.bf16.msrb.mxu1 %v901_v4  ;;  %595 = vmatpush.bf16.msra.mxu2 %v916_v48 }
  0x42   :  { %538 = vmatpush.bf16.msrb.mxu3 %v908_v11 }
  0x44   :  { %524 = vmatpush.bf16.msrb.mxu1 %v900_v6  ;;  %596 = vmatpush.bf16.msra.mxu2 %v915_v49 }
  0x46   :  { %539 = vmatpush.bf16.msrb.mxu3 %v907_v13 }
  0x48   :  { %525 = vmatpush.bf16.msrb.mxu1 %v899_v8 }
  0x9a   :  { %v333_v14 = vpop.f32.mrf.mxu2 }
  0xa2   :  { %v335_v21 = vpop.f32.mrf.mxu2 }
  0xa6   :  { %v305_v16 = vpop.f32.mrf.mxu0 }
  0xa7   :  { %v306_v18 = vadd.f32 %v305_v16, %v93_v15 }
  0xa8   :  { %v319_v17 = vpop.f32.mrf.mxu1 }
  0xa9   :  { %v320_v19 = vadd.f32 %v319_v17, %v306_v18 }
  0xab   :  { %v334_v24 = vadd.f32 %v333_v14, %v320_v19 }
  0xac   :  { %v347_v25 = vpop.f32.mrf.mxu3 }
  0xad   :  { %v380_v29 = vmax.f32 %v334_v24, 0.0  ;;  %v348_v34 = vadd.f32 %v347_v25, %v94_v28 }
  0xae   :  { %v307_v20 = vpop.f32.mrf.mxu0 }
  0xaf   :  { %v308_v22 = vadd.f32 %v307_v20, %v93_v15 }
  0xb0   :  { %v321_v23 = vpop.f32.mrf.mxu1 }
  0xb1   :  { %v322_v26 = vadd.f32 %v321_v23, %v308_v22 }
  0xb3   :  { %v336_v27 = vadd.f32 %v335_v21, %v322_v26 }
  0xb4   :  { %v349_v35 = vpop.f32.mrf.mxu3 }
  0xb5   :  { %v382_v30 = vmax.f32 %v336_v27, 0.0  ;;  %v350_v37 = vadd.f32 %v349_v35, %v94_v28 }
  0xb6   :  { %v375_v32 = vpop.f32.mrf.mxu0 }
  0xb7   :  { %v384_v33 = vpack.c.bf16 %v382_v30, %v380_v29 }
  0xb9   :  { %526 = vmatmul.bf16.vlgmr.msrb.gmra.mxu1 %v384_v33 }
  0xba   :  { %v361_v31 = vpop.f32.mrf.mxu2 }
  0xbb   :  { %v362_v36 = vadd.f32 %v361_v31, %v348_v34 }
  0xbd   :  { %v376_v39 = vadd.f32 %v375_v32, %v362_v36 }
  0xbe   :  { %v377_v41 = vpop.f32.mrf.mxu0 }
  0xbf   :  { %v381_v43 = vmax.f32 %v376_v39, 0.0 }
  0xc2   :  { %v363_v38 = vpop.f32.mrf.mxu2 }
  0xc3   :  { %v364_v40 = vadd.f32 %v363_v38, %v350_v37 }
  0xc5   :  { %v378_v42 = vadd.f32 %v377_v41, %v364_v40 }
  0xc7   :  { %v383_v44 = vmax.f32 %v378_v42, 0.0 }
  0xc9   :  { %v385_v45 = vpack.c.bf16 %v383_v44, %v381_v43 }
  0xcb   :  { %540 = vmatmul.bf16.vlgmr.msrb.gmra.mxu3 %v385_v45 }
 0x136   :  { %v527_v50 = vpop.f32.mrf.mxu1 }
 0x137   :  { %v528_v54 = vadd.f32 %v930_v52, %v527_v50 }
 0x13e   :  { %v529_v53 = vpop.f32.mrf.mxu1 }
 0x13f   :  { %v530_v55 = vadd.f32 %v930_v52, %v529_v53 }
 0x14e   :  { %v541_v51 = vpop.f32.mrf.mxu3 }
 0x14f   :  { %v542_v56 = vadd.f32 %v541_v51, %v528_v54 }
 0x151   :  { %v546_v60 = vmax.f32 %v542_v56, 0.0 }
 0x156   :  { %v543_v57 = vpop.f32.mrf.mxu3 }
 0x157   :  { %v544_v59 = vadd.f32 %v543_v57, %v530_v55 }
 0x159   :  { %v547_v61 = vmax.f32 %v544_v59, 0.0 }
 0x15b   :  { %v548_v62 = vpack.c.bf16 %v547_v61, %v546_v60 }
 0x15d   :  { %860 = vmatmul.msk.bf16.vlgmr.msra.gmra.mxu2 %vm585_vm2, %v548_v62 }
 0x1e0   :  { %v598_v63 = vpop.f32.mrf.mxu2 }
 0x1e1   :  { %v599_v2 = vadd.f32 %v931_v0, %v598_v63 }
 0x1e8   :  { %v600_v1 = vpop.f32.mrf.mxu2 }
 0x1e9   :  { %v601_v58 = vadd.f32 %v931_v0, %v600_v1 }
 0x1eb   :  { %v922_v3 = vpack.c.bf16 %v601_v58, %v599_v2 }
 0x1ed   :  { %923 = vst [vmem:[#allocation5] sm:$0xff] %v922_v3  }
 0x1ee   :  { %619 = dma.vmem_to_hbm [thread:$0]  %s612_s13, 128, %s614_s15, [#allocation4], %s988_s16, %s988_s16, %s989_s17  }
 0x1ef   :  { %982 = dma.done.wait [#allocation4], 128  }
 0x1f0   :  { %983 = vsyncadd [#allocation4], 4294967168 }
 0x1f1   :  { %624 = vsyncpa [#allocation3], 1 }
 0x1f2   :  { %625 = vsyncpa [#allocation4], 1 }

</bundles_post_ra>
